<compile_context>
chip_gen: v6e
topology: v6e:2x2x1
jax: 0.10.0
libtpu: 0.0.40
codegen_flags: <defaults>
</compile_context>

<pallas_src>
import numpy as np
import jax
import jax.numpy as jnp
from jax.experimental import pallas as pl
from jax.experimental.pallas import tpu as pltpu

_LANE = 128       # pad class axis to full lane width
_SUBLANE = 8      # batch tile must be a multiple of the sublane count
_NEG_INF = -1e30  # bias for padded classes -> exp underflows to 0 in softmax


def _round_up(x, m):
    return ((x + m - 1) // m) * m


def _cdiv(a, b):
    return (a + b - 1) // b


def _logistic_kernel(x_ref, w_ref, b_ref, o_ref):
    # x_ref : (TB, D)      f32   batch tile of flattened inputs (cast to bf16 on the VPU here)
    # w_ref : (D, C_pad)   bf16  pre-transposed Linear weight, resident in VMEM
    # b_ref : (1, C_pad)   f32   bias (padded classes hold -1e30)
    # o_ref : (TB, C_pad)  f32   softmax probabilities
    x_bf16 = x_ref[...].astype(jnp.bfloat16)
    logits = jnp.dot(x_bf16, w_ref[...], preferred_element_type=jnp.float32) + b_ref[...]
    m = jnp.max(logits, axis=-1, keepdims=True)
    e = jnp.exp(logits - m)
    denom = jnp.sum(e, axis=-1, keepdims=True)
    o_ref[...] = (e * pl.reciprocal(denom, approx=False)).astype(o_ref.dtype)


def multiclass_logistic_forward(x_nchw, weight, bias, *, batch_tile=256):
    """Forward pass equivalent to the PyTorch MultiClassLogistic module.

    x_nchw : (B, C, H, W) float32
    weight : (n_class, D) float32  -- nn.Linear weight (D = C*H*W)
    bias   : (n_class,)   float32  -- nn.Linear bias
    returns: (B, n_class) float32 softmax probabilities
    """
    B = x_nchw.shape[0]
    D = int(np.prod(x_nchw.shape[1:]))
    C = weight.shape[0]
    C_pad = _round_up(C, _LANE)

    # ---- batch tile selection -------------------------------------------------------------
    TB = _round_up(max(batch_tile, _SUBLANE), _SUBLANE)
    TB = min(TB, _round_up(B, _SUBLANE))          # never bigger than the (rounded) batch
    if B >= 2 * _SUBLANE:
        # keep >= 2 grid tiles so "parallel" can shard across both v7x TensorCores
        TB = min(TB, _round_up(_cdiv(B, 2), _SUBLANE))

    # shrink TB if the per-step VMEM residency would blow a conservative 40 MiB budget
    def _residency(tb):
        return (2 * tb * D * 4          # double-buffered f32 x stream
                + 2 * D * C_pad * 2     # resident bf16 weight (double-buffered)
                + 2 * C_pad * 4         # bias
                + 2 * tb * C_pad * 4    # double-buffered f32 output
                + 3 * tb * C_pad * 4)   # logits / exp temporaries headroom
    _BUDGET = 40 << 20
    while TB > _SUBLANE and _residency(TB) > _BUDGET:
        TB = max(_SUBLANE, _round_up(TB // 2, _SUBLANE))

    n_tiles = _cdiv(B, TB)

    # ---- operand prep (parameter-side only; x stays f32 and untouched) ---------------------
    x2d = x_nchw.reshape(B, D)                                   # nn.Flatten, no pad, no cast

    w_t = weight.astype(jnp.bfloat16)                            # (C, D) bf16
    if C_pad != C:
        w_t = jnp.pad(w_t, ((0, C_pad - C), (0, 0)))
    w_t = w_t.T                                                  # (D, C_pad) -- one-time transpose

    b2d = jnp.full((1, C_pad), _NEG_INF, dtype=jnp.float32)
    b2d = b2d.at[0, :C].set(bias.astype(jnp.float32))

    cost = pl.CostEstimate(
        flops=2 * n_tiles * TB * D * C_pad,
        transcendentals=n_tiles * TB * C_pad,
        bytes_accessed=(B * D * 4 + D * C_pad * 2 + C_pad * 4 + B * C_pad * 4),
    )

    vmem_limit = int(min(max(_residency(TB) + (2 << 20), 16 << 20), 48 << 20))

    out = pl.pallas_call(
        _logistic_kernel,
        out_shape=jax.ShapeDtypeStruct((B, C_pad), jnp.float32),
        grid_spec=pltpu.PrefetchScalarGridSpec(
            num_scalar_prefetch=0,
            grid=(n_tiles,),
            in_specs=[
                pl.BlockSpec((TB, D), lambda i: (i, 0)),       # x streams over batch tiles (f32)
                pl.BlockSpec((D, C_pad), lambda i: (0, 0)),    # weight resident in VMEM (bf16)
                pl.BlockSpec((1, C_pad), lambda i: (0, 0)),    # bias resident in VMEM (f32)
            ],
            out_specs=pl.BlockSpec((TB, C_pad), lambda i: (i, 0)),
        ),
        compiler_params=pltpu.CompilerParams(
            dimension_semantics=("parallel",),  # batch tiles independent -> dual-TC on v7x
            vmem_limit_bytes=vmem_limit,
        ),
        cost_estimate=cost,
    )(x2d, w_t, b2d)

    # Strip class padding (ragged batch rows, if any, are already masked on store).
    return out[:B, :C]


if __name__ == "__main__":
    # Small shapes consistent with the module: input_shape = (4, 16, 16), n_class = 10.
    B, Cin, H, W = 2, 4, 16, 16
    n_class = 10
    D = Cin * H * W

    key = jax.random.PRNGKey(0)
    kx, kw, kb = jax.random.split(key, 3)

    x = jax.random.normal(kx, (B, Cin, H, W), dtype=jnp.float32)

    # Deterministic parameter init mimicking nn.Linear default (U[-1/sqrt(D), 1/sqrt(D)]).
    bound = 1.0 / np.sqrt(D)
    weight = jax.random.uniform(kw, (n_class, D), minval=-bound, maxval=bound,
                                dtype=jnp.float32)
    bias = jax.random.uniform(kb, (n_class,), minval=-bound, maxval=bound,
                              dtype=jnp.float32)

    probs = multiclass_logistic_forward(x, weight, bias)
    jax.block_until_ready(probs)

    assert probs.shape == (B, n_class)

    # Reference with matching bf16 operand rounding + f32 accumulation (same numerics as kernel).
    x2d = x.reshape(B, D)
    logits_bf16 = jnp.dot(x2d.astype(jnp.bfloat16), weight.astype(jnp.bfloat16).T,
                          preferred_element_type=jnp.float32) + bias
    probs_bf16_ref = jax.nn.softmax(logits_bf16, axis=1)
    np.testing.assert_allclose(np.asarray(probs), np.asarray(probs_bf16_ref),
                               rtol=1e-3, atol=1e-4)

    # Loose check against the exact f32 PyTorch-equivalent forward (bf16 operands => looser tol).
    probs_f32_ref = jax.nn.softmax(x2d @ weight.T + bias, axis=1)
    np.testing.assert_allclose(np.asarray(probs), np.asarray(probs_f32_ref),
                               rtol=5e-2, atol=5e-3)

    # Rows must still sum to 1 (padded classes fully suppressed).
    np.testing.assert_allclose(np.asarray(probs).sum(axis=1), np.ones(B),
                               rtol=1e-5, atol=1e-5)

    print("KERNEL_OK")
</pallas_src>

<mosaic_0001>
module attributes {stable_mosaic.version = 11 : i64} {
  func.func @_logistic_kernel(%arg0: i32, %arg1: memref<8x1024xf32, #tpu.memory_space<vmem>>, %arg2: memref<1024x128xbf16, #tpu.memory_space<vmem>>, %arg3: memref<1x128xf32, #tpu.memory_space<vmem>>, %arg4: memref<8x128xf32, #tpu.memory_space<vmem>>) attributes {dimension_semantics = [#tpu.dimension_semantics<parallel>], iteration_bounds = array<i64: 1>, scalar_prefetch = 0 : i64, scratch_operands = 0 : i64, tpu.core_type = #tpu.core_type<tc>, window_params = [{transform_indices = @transform_0, window_bounds = array<i64: 8, 1024>}, {pipeline_mode = #tpu.pipeline_mode<synchronous>, transform_indices = @transform_1, window_bounds = array<i64: 1024, 128>}, {pipeline_mode = #tpu.pipeline_mode<synchronous>, transform_indices = @transform_2, window_bounds = array<i64: 1, 128>}, {transform_indices = @transform_3, window_bounds = array<i64: 8, 128>}]} {
    %c0 = arith.constant 0 : index
    %c0_0 = arith.constant 0 : index
    %0 = vector.load %arg1[%c0, %c0_0] : memref<8x1024xf32, #tpu.memory_space<vmem>>, vector<8x1024xf32>
    %1 = arith.truncf %0 : vector<8x1024xf32> to vector<8x1024xbf16>
    %c0_1 = arith.constant 0 : index
    %c0_2 = arith.constant 0 : index
    %2 = vector.load %arg2[%c0_1, %c0_2] : memref<1024x128xbf16, #tpu.memory_space<vmem>>, vector<1024x128xbf16>
    %cst = arith.constant dense<0.000000e+00> : vector<8x128xf32>
    %3 = tpu.matmul %1, %2, %cst {dimension_numbers = #tpu.dot_dimension_numbers<[1], [0], [0], [1], [0, 0, 1, 1], [], []>} : vector<8x1024xbf16>, vector<1024x128xbf16>, vector<8x128xf32> -> vector<8x128xf32>
    %c0_3 = arith.constant 0 : index
    %c0_4 = arith.constant 0 : index
    %4 = vector.load %arg3[%c0_3, %c0_4] : memref<1x128xf32, #tpu.memory_space<vmem>>, vector<1x128xf32>
    %5 = vector.broadcast %4 : vector<1x128xf32> to vector<8x128xf32>
    %6 = arith.addf %3, %5 : vector<8x128xf32>
    %cst_5 = arith.constant dense<0xFF800000> : vector<8xf32>
    %7 = vector.multi_reduction <maximumf>, %6, %cst_5 [1] : vector<8x128xf32> to vector<8xf32>
    %8 = vector.shape_cast %7 : vector<8xf32> to vector<8x1xf32>
    %9 = vector.broadcast %8 : vector<8x1xf32> to vector<8x128xf32>
    %10 = arith.subf %6, %9 : vector<8x128xf32>
    %11 = math.exp %10 : vector<8x128xf32>
    %cst_6 = arith.constant dense<0.000000e+00> : vector<8xf32>
    %12 = vector.multi_reduction <add>, %11, %cst_6 [1] : vector<8x128xf32> to vector<8xf32>
    %13 = vector.shape_cast %12 : vector<8xf32> to vector<8x1xf32>
    %14 = tpu.reciprocal %13 : vector<8x1xf32> -> vector<8x1xf32>
    %15 = vector.broadcast %14 : vector<8x1xf32> to vector<8x128xf32>
    %16 = arith.mulf %11, %15 : vector<8x128xf32>
    %c0_7 = arith.constant 0 : index
    %c0_8 = arith.constant 0 : index
    %17 = vector.load %arg4[%c0_7, %c0_8] : memref<8x128xf32, #tpu.memory_space<vmem>>, vector<8x128xf32>
    tpu.vector_store %arg4[%c0_7, %c0_8], %16 {strides = array<i32>} : memref<8x128xf32, #tpu.memory_space<vmem>>, vector<8x128xf32>,
    return
  }
  func.func @transform_0(%arg0: i32) -> (i32, i32) {
    %c0_i32 = arith.constant 0 : i32
    %c0_i32_0 = arith.constant 0 : i32
    return %arg0, %c0_i32 : i32, i32
  }
  func.func @transform_1(%arg0: i32) -> (i32, i32) {
    %c0_i32 = arith.constant 0 : i32
    %c0_i32_0 = arith.constant 0 : i32
    %c0_i32_1 = arith.constant 0 : i32
    return %c0_i32, %c0_i32_0 : i32, i32
  }
  func.func @transform_2(%arg0: i32) -> (i32, i32) {
    %c0_i32 = arith.constant 0 : i32
    %c0_i32_0 = arith.constant 0 : i32
    %c0_i32_1 = arith.constant 0 : i32
    return %c0_i32, %c0_i32_0 : i32, i32
  }
  func.func @transform_3(%arg0: i32) -> (i32, i32) {
    %c0_i32 = arith.constant 0 : i32
    %c0_i32_0 = arith.constant 0 : i32
    return %arg0, %c0_i32 : i32, i32
  }
}

</mosaic_0001>

<bundles_post_ra>
// kernel: tpu_custom_call.1
= control target key start
LH: loop header
LB: loop body
LE: loop exit
PB: predicated region body
PF: predicated region fallthrough
CT: control target
= control target key end

     0   :  { %8 = vsyncpa [#allocation3], 0  ;;  %s1216_s0 = inlined_call_operand.hbm [shape: f32[2,1024], index: 0, kind: input, shape index: {}]   ;;  %s1217_s1 = inlined_call_operand.hbm [shape: bf16[1024,128], index: 1, kind: input, shape index: {}]   ;;  %s1218_s2 = inlined_call_operand.vmem [shape: f32[1,128], index: 2, kind: input, shape index: {}]   ;;  %s1219_s3 = inlined_call_operand.hbm [shape: f32[2,128], index: 3, kind: output, shape index: {}]  }
   0x1   :  { %9 = vsyncpa [#allocation6], 0 }
   0x2   :  { %10 = vsyncpa [#allocation4], 0 }
   0x3   :  { %15 = vsyncadd [#allocation3], 768  ;;  %s1164_s12 = smov [#allocation2]  }
   0x4   :  { %s16_s13 = sshll.u32 %s1164_s12, 4  ;;  %s17_s13 = int_to_ptr.vmem [resolvable:$true] %s16_s13 }
   0x5   :  { %s1106_s14 = scalar_lea.vmem %s17_s13, 256  ;;  %s1110_s15 = scalar_lea.vmem %s17_s13, 1024 }
   0x6   :  { %p1107_p0 = scmp.ne.s32.totalorder %s17_s13, %s1106_s14  ;;  %p1111_p1 = scmp.lt.s32.totalorder %s17_s13, %s17_s13 }
   0x7   :  { %p1112_p2 = scmp.lt.s32.totalorder %s1110_s15, %s1106_s14 }
   0x9   :  { %p1113_p3 = por %p1112_p2, %p1111_p1 }
   0xb   :  { %p1114_p4 = pnand %p1113_p3, %p1107_p0 }
   0xd   :  { %1117 = shalt.err (!%p1114_p4)
}
   0xe   :  { %s1165_s16 = smov 256   ;;  %s1166_s17 = smov 16  }
   0xf   :  { %22 = dma.hbm_to_vmem [thread:$0]  %s1216_s0, 256, %s17_s13, [#allocation3], %s1165_s16, %s1165_s16, %s1166_s17  }
  0x10   :  { %s1167_s20 = smov [#allocation5]  }
  0x11   :  { %s28_s21 = sshll.u32 %s1167_s20, 4  ;;  %s29_s21 = int_to_ptr.vmem [resolvable:$true] %s28_s21 }
  0x12   :  { %s1126_s22 = scalar_lea.vmem %s29_s21, 8192  ;;  %p1131_p6 = scmp.lt.s32.totalorder %s29_s21, %s29_s21 }
  0x13   :  { %p1127_p5 = scmp.ne.s32.totalorder %s29_s21, %s1126_s22  ;;  %p1132_p7 = scmp.lt.s32.totalorder %s1126_s22, %s1126_s22 }
  0x15   :  { %p1133_p8 = por %p1132_p7, %p1131_p6 }
  0x17   :  { %p1134_p9 = pnand %p1133_p8, %p1127_p5 }
  0x19   :  { %1137 = shalt.err (!%p1134_p9)
}
  0x1a   :  { %s1168_s23 = smov 64   ;;  %s1169_s24 = smov 4  }
  0x1b   :  { %34 = dma.hbm_to_vmem [thread:$0]  %s1217_s1, 8192, %s29_s21, [#allocation6], %s1168_s23, %s1168_s23, %s1169_s24  }
  0x1c   :  { %1158 = dma.done.wait [#allocation3], 1024  }
  0x1d   :  { %1159 = vsyncadd [#allocation3], 4294966272 }
  0x1e   :  { %1160 = dma.done.wait [#allocation6], 8192  }
  0x1f   :  { %1161 = vsyncadd [#allocation6], 4294959104  ;;  %v1018_v0 = vld [vmem:[#allocation5 + $0x78] sm:$0xff]   ;;  %v1022_v4 = vld [vmem:[#allocation5 + $0x70] sm:$0xff]   ;;  %v1170_v24 = vmov 1983009808   ;;  %v67_v26 = vlaneseq }
  0x20   :  { %v1019_v1 = vld [vmem:[#allocation5 + $0xf8] sm:$0xff]   ;;  %920 = vmatprep.subr.bf16.mxu0 %v1018_v0  ;;  %v1023_v5 = vld [vmem:[#allocation5 + $0xf0] sm:$0xff]   ;;  %v1026_v8 = vld [vmem:[#allocation5 + $0x68] sm:$0xff]   ;;  %v65_v25 = vunpack.c.l.s4 %v1170_v24 }
  0x21   :  { %v1020_v2 = vld [vmem:[#allocation5 + $0x38] sm:$0xff]   ;;  %942 = vmatprep.subr.bf16.mxu1 %v1019_v1  ;;  %v1024_v6 = vld [vmem:[#allocation5 + $0x30] sm:$0xff]   ;;  %v1027_v9 = vld [vmem:[#allocation5 + $0xe8] sm:$0xff]   ;;  %v68_v32 = vshrl.u32 %v67_v26, 7 }
  0x22   :  { %v1021_v3 = vld [vmem:[#allocation5 + $0xb8] sm:$0xff]   ;;  %921 = vmatpush3.bf16.msra.mxu0 %v1020_v2  ;;  %v1025_v7 = vld [vmem:[#allocation5 + $0xb0] sm:$0xff]   ;;  %v1028_v10 = vld [vmem:[#allocation5 + $0x28] sm:$0xff]   ;;  %v66_v31 = vunpack.c.0.s8 %v65_v25 }
  0x23   :  { %943 = vmatpush3.bf16.msra.mxu1 %v1021_v3  ;;  %922 = vmatprep.subr.bf16.mxu0 %v1022_v4  ;;  %v1029_v11 = vld [vmem:[#allocation5 + $0xa8] sm:$0xff]   ;;  %v1030_v12 = vld [vmem:[#allocation5 + $0x60] sm:$0xff]   ;;  %v1034_v16 = vld [vmem:[#allocation5 + $0x58] sm:$0xff]  }
  0x24   :  { %944 = vmatprep.subr.bf16.mxu1 %v1023_v5  ;;  %v1031_v13 = vld [vmem:[#allocation5 + $0xe0] sm:$0xff]   ;;  %v1035_v17 = vld [vmem:[#allocation5 + $0xd8] sm:$0xff]   ;;  %v1038_v20 = vld [vmem:[#allocation5 + $0x50] sm:$0xff]   ;;  %v1200_v37 = vsub.s32 %v66_v31, %v68_v32 }
  0x25   :  { %v1032_v14 = vld [vmem:[#allocation5 + $0x20] sm:$0xff]   ;;  %v1036_v18 = vld [vmem:[#allocation5 + $0x18] sm:$0xff]   ;;  %v1039_v21 = vld [vmem:[#allocation5 + $0xd0] sm:$0xff]  }
  0x26   :  { %923 = vmatpush3.bf16.msra.mxu0 %v1024_v6  ;;  %v1033_v15 = vld [vmem:[#allocation5 + $0xa0] sm:$0xff]   ;;  %v1037_v19 = vld [vmem:[#allocation5 + $0x98] sm:$0xff]   ;;  %v1040_v22 = vld [vmem:[#allocation5 + $0x10] sm:$0xff]  }
  0x27   :  { %945 = vmatpush3.bf16.msra.mxu1 %v1025_v7  ;;  %924 = vmatprep.subr.bf16.mxu0 %v1026_v8  ;;  %v1041_v23 = vld [vmem:[#allocation5 + $0x90] sm:$0xff]   ;;  %v1042_v27 = vld [vmem:[#allocation5 + $0x48] sm:$0xff]   ;;  %v1046_v33 = vld [vmem:[#allocation5 + $0x40] sm:$0xff]  }
  0x28   :  { %946 = vmatprep.subr.bf16.mxu1 %v1027_v9  ;;  %v1043_v28 = vld [vmem:[#allocation5 + $0xc8] sm:$0xff]   ;;  %v1047_v34 = vld [vmem:[#allocation5 + $0xc0] sm:$0xff]   ;;  %v1056_v44 = vld [vmem:[#allocation5 + $0x178] sm:$0xff]  }
  0x29   :  { %v1044_v29 = vld [vmem:[#allocation5 + $0x8] sm:$0xff]   ;;  %v1048_v35 = vld [vmem:[#allocation5] sm:$0xff]   ;;  %v1057_v47 = vld [vmem:[#allocation5 + $0x1f8] sm:$0xff]  }
  0x2a   :  { %925 = vmatpush3.bf16.msra.mxu0 %v1028_v10  ;;  %v1045_v30 = vld [vmem:[#allocation5 + $0x88] sm:$0xff]   ;;  %v1049_v36 = vld [vmem:[#allocation5 + $0x80] sm:$0xff]   ;;  %v1058_v50 = vld [vmem:[#allocation5 + $0x138] sm:$0xff]  }
  0x2b   :  { %947 = vmatpush3.bf16.msra.mxu1 %v1029_v11  ;;  %926 = vmatprep.subr.bf16.mxu0 %v1030_v12  ;;  %v1050_v38 = vld [vmem:[#allocation2] ss:$16 sps:$4 sm:$0xff]   ;;  %v1054_v40 = vld [vmem:[#allocation2 + $0x4] ss:$16 sps:$4 sm:$0xff]   ;;  %v1059_v53 = vld [vmem:[#allocation5 + $0x1b8] sm:$0xff]  }
  0x2c   :  { %948 = vmatprep.subr.bf16.mxu1 %v1031_v13  ;;  %v1052_v39 = vld [vmem:[#allocation2 + $0x20] ss:$16 sps:$4 sm:$0xff]   ;;  %v1055_v41 = vld [vmem:[#allocation2 + $0x24] ss:$16 sps:$4 sm:$0xff]   ;;  %v70_v42 = vrot.slane %v1050_v38, %v1200_v37  ;;  %v77_v45 = vrot.slane %v1054_v40, %v1200_v37  ;;  %v1064_v62 = vld [vmem:[#allocation5 + $0x168] sm:$0xff]  }
  0x2d   :  { %v84_v43 = vrot.slane %v1052_v39, %v1200_v37  ;;  %v91_v46 = vrot.slane %v1055_v41, %v1200_v37  ;;  %v1060_v56 = vld [vmem:[#allocation5 + $0x170] sm:$0xff]   ;;  %v1065_v63 = vld [vmem:[#allocation5 + $0x1e8] sm:$0xff]   ;;  %v1068_v2 = vld [vmem:[#allocation5 + $0x160] sm:$0xff]  }
  0x2e   :  { %927 = vmatpush3.bf16.msra.mxu0 %v1032_v14  ;;  %v1061_v59 = vld [vmem:[#allocation5 + $0x1f0] sm:$0xff]   ;;  %v1066_v0 = vld [vmem:[#allocation5 + $0x128] sm:$0xff]   ;;  %v1069_v3 = vld [vmem:[#allocation5 + $0x1e0] sm:$0xff]  }
  0x2f   :  { %949 = vmatpush3.bf16.msra.mxu1 %v1033_v15  ;;  %928 = vmatprep.subr.bf16.mxu0 %v1034_v16  ;;  %v93_v48 = vcombine.high %v70_v42, %v84_v43  ;;  %v92_v49 = vcombine.low %v70_v42, %v84_v43  ;;  %v95_v51 = vcombine.high %v77_v45, %v91_v46  ;;  %v1062_v60 = vld [vmem:[#allocation5 + $0x130] sm:$0xff]   ;;  %v1067_v1 = vld [vmem:[#allocation5 + $0x1a8] sm:$0xff]   ;;  %v1070_v4 = vld [vmem:[#allocation5 + $0x120] sm:$0xff]  }
  0x30   :  { %950 = vmatprep.subr.bf16.mxu1 %v1035_v17  ;;  %v94_v52 = vcombine.low %v77_v45, %v91_v46  ;;  %v1063_v61 = vld [vmem:[#allocation5 + $0x1b0] sm:$0xff]   ;;  %v1071_v5 = vld [vmem:[#allocation5 + $0x1a0] sm:$0xff]   ;;  %v1072_v6 = vld [vmem:[#allocation5 + $0x158] sm:$0xff]  }
  0x31   :  { %v141_v54 = vpack.c.bf16 %v93_v48, %v93_v48  ;;  %v140_v55 = vpack.c.bf16 %v92_v49, %v92_v49  ;;  %v143_v57 = vpack.c.bf16 %v95_v51, %v95_v51  ;;  %v1073_v7 = vld [vmem:[#allocation5 + $0x1d8] sm:$0xff]   ;;  %v1076_v10 = vld [vmem:[#allocation5 + $0x150] sm:$0xff]   ;;  %v1080_v14 = vld [vmem:[#allocation5 + $0x148] sm:$0xff]  }
  0x32   :  { %929 = vmatpush3.bf16.msra.mxu0 %v1036_v18  ;;  %v142_v58 = vpack.c.bf16 %v94_v52, %v94_v52  ;;  %v1074_v8 = vld [vmem:[#allocation5 + $0x118] sm:$0xff]   ;;  %v1077_v11 = vld [vmem:[#allocation5 + $0x1d0] sm:$0xff]   ;;  %v1081_v15 = vld [vmem:[#allocation5 + $0x1c8] sm:$0xff]  }
  0x33   :  { %951 = vmatpush3.bf16.msra.mxu1 %v1037_v19  ;;  %930 = vmatprep.subr.bf16.mxu0 %v1038_v20  ;;  %v1075_v9 = vld [vmem:[#allocation5 + $0x198] sm:$0xff]   ;;  %v1078_v12 = vld [vmem:[#allocation5 + $0x110] sm:$0xff]   ;;  %v1082_v16 = vld [vmem:[#allocation5 + $0x108] sm:$0xff]  }
  0x34   :  { %952 = vmatprep.subr.bf16.mxu1 %v1039_v21  ;;  %699 = vmatprep.mubr.bf16.mxu0 %v141_v54  ;;  %v1079_v13 = vld [vmem:[#allocation5 + $0x190] sm:$0xff]   ;;  %v1083_v17 = vld [vmem:[#allocation5 + $0x188] sm:$0xff]   ;;  %v1084_v18 = vld [vmem:[#allocation5 + $0x140] sm:$0xff]  }
  0x35   :  { %739 = vmatprep.mubr.bf16.mxu1 %v143_v57  ;;  %v1085_v19 = vld [vmem:[#allocation5 + $0x1c0] sm:$0xff]   ;;  %v1092_v24 = vld [vmem:[#allocation2 + $0xc] ss:$16 sps:$4 sm:$0xff]  }
  0x36   :  { %931 = vmatpush3.bf16.msra.mxu0 %v1040_v22  ;;  %v1086_v20 = vld [vmem:[#allocation5 + $0x100] sm:$0xff]   ;;  %v1088_v22 = vld [vmem:[#allocation2 + $0x8] ss:$16 sps:$4 sm:$0xff]   ;;  %v1093_v25 = vld [vmem:[#allocation2 + $0x2c] ss:$16 sps:$4 sm:$0xff]  }
  0x37   :  { %953 = vmatpush3.bf16.msra.mxu1 %v1041_v23  ;;  %932 = vmatprep.subr.bf16.mxu0 %v1042_v27  ;;  %v1087_v21 = vld [vmem:[#allocation5 + $0x180] sm:$0xff]   ;;  %v1090_v23 = vld [vmem:[#allocation2 + $0x28] ss:$16 sps:$4 sm:$0xff]   ;;  %v106_v26 = vrot.slane %v1088_v22, %v1200_v37 }
  0x38   :  { %954 = vmatprep.subr.bf16.mxu1 %v1043_v28  ;;  %v120_v27 = vrot.slane %v1090_v23, %v1200_v37  ;;  %v113_v28 = vrot.slane %v1092_v24, %v1200_v37 }
  0x3a   :  { %933 = vmatpush3.bf16.msra.mxu0 %v1044_v29  ;;  %v127_v29 = vrot.slane %v1093_v25, %v1200_v37  ;;  %v128_v31 = vcombine.low %v106_v26, %v120_v27 }
  0x3b   :  { %955 = vmatpush3.bf16.msra.mxu1 %v1045_v30  ;;  %934 = vmatprep.subr.bf16.mxu0 %v1046_v33  ;;  %v129_v30 = vcombine.high %v106_v26, %v120_v27 }
  0x3c   :  { %956 = vmatprep.subr.bf16.mxu1 %v1047_v34  ;;  %v131_v32 = vcombine.high %v113_v28, %v127_v29  ;;  %v130_v33 = vcombine.low %v113_v28, %v127_v29 }
  0x3d   :  { %v145_v34 = vpack.c.bf16 %v129_v30, %v129_v30 }
  0x3e   :  { %935 = vmatpush3.bf16.msra.mxu0 %v1048_v35  ;;  %v144_v35 = vpack.c.bf16 %v128_v31, %v128_v31  ;;  %v146_v38 = vpack.c.bf16 %v130_v33, %v130_v33 }
  0x3f   :  { %957 = vmatpush3.bf16.msra.mxu1 %v1049_v36  ;;  %964 = vmatprep.subr.bf16.mxu0 %v1056_v44  ;;  %v147_v36 = vpack.c.bf16 %v131_v32, %v131_v32 }
  0x40   :  { %986 = vmatprep.subr.bf16.mxu1 %v1057_v47  ;;  %v855_v47 = vld [vmem:[%s1218_s2] ss:$0 sm:$0xff] }
  0x41   :  { %700 = vmatmul.mubr.bf16.vlgmr.msra.gmra.mxu0 %v140_v55 }
  0x42   :  { %740 = vmatmul.mubr.bf16.vlgmr.msra.gmra.mxu1 %v142_v58  ;;  %965 = vmatpush3.bf16.msra.mxu0 %v1058_v50 }
  0x43   :  { %987 = vmatpush3.bf16.msra.mxu1 %v1059_v53  ;;  %966 = vmatprep.subr.bf16.mxu0 %v1060_v56 }
  0x44   :  { %988 = vmatprep.subr.bf16.mxu1 %v1061_v59  ;;  %779 = vmatprep.mubr.bf16.mxu0 %v145_v34 }
  0x45   :  { %819 = vmatprep.mubr.bf16.mxu1 %v147_v36 }
  0x46   :  { %967 = vmatpush3.bf16.msra.mxu0 %v1062_v60 }
  0x47   :  { %989 = vmatpush3.bf16.msra.mxu1 %v1063_v61  ;;  %968 = vmatprep.subr.bf16.mxu0 %v1064_v62 }
  0x48   :  { %990 = vmatprep.subr.bf16.mxu1 %v1065_v63 }
  0x4a   :  { %969 = vmatpush3.bf16.msra.mxu0 %v1066_v0 }
  0x4b   :  { %991 = vmatpush3.bf16.msra.mxu1 %v1067_v1  ;;  %970 = vmatprep.subr.bf16.mxu0 %v1068_v2 }
  0x4c   :  { %992 = vmatprep.subr.bf16.mxu1 %v1069_v3 }
  0x4e   :  { %971 = vmatpush3.bf16.msra.mxu0 %v1070_v4 }
  0x4f   :  { %993 = vmatpush3.bf16.msra.mxu1 %v1071_v5  ;;  %972 = vmatprep.subr.bf16.mxu0 %v1072_v6 }
  0x50   :  { %994 = vmatprep.subr.bf16.mxu1 %v1073_v7 }
  0x52   :  { %973 = vmatpush3.bf16.msra.mxu0 %v1074_v8 }
  0x53   :  { %995 = vmatpush3.bf16.msra.mxu1 %v1075_v9  ;;  %974 = vmatprep.subr.bf16.mxu0 %v1076_v10 }
  0x54   :  { %996 = vmatprep.subr.bf16.mxu1 %v1077_v11 }
  0x56   :  { %975 = vmatpush3.bf16.msra.mxu0 %v1078_v12 }
  0x57   :  { %997 = vmatpush3.bf16.msra.mxu1 %v1079_v13  ;;  %976 = vmatprep.subr.bf16.mxu0 %v1080_v14 }
  0x58   :  { %998 = vmatprep.subr.bf16.mxu1 %v1081_v15 }
  0x5a   :  { %977 = vmatpush3.bf16.msra.mxu0 %v1082_v16 }
  0x5b   :  { %999 = vmatpush3.bf16.msra.mxu1 %v1083_v17  ;;  %978 = vmatprep.subr.bf16.mxu0 %v1084_v18 }
  0x5c   :  { %1000 = vmatprep.subr.bf16.mxu1 %v1085_v19 }
  0x5e   :  { %979 = vmatpush3.bf16.msra.mxu0 %v1086_v20 }
  0x5f   :  { %1001 = vmatpush3.bf16.msra.mxu1 %v1087_v21 }
  0x61   :  { %780 = vmatmul.mubr.bf16.vlgmr.msra.gmra.mxu0 %v144_v35 }
  0x62   :  { %820 = vmatmul.mubr.bf16.vlgmr.msra.gmra.mxu1 %v146_v38 }
 0x101   :  { %v936_v39 = vpop.f32.mrf.mxu0 }
 0x102   :  { %v958_v40 = vpop.f32.mrf.mxu1 }
 0x103   :  { %v937_v41 = vpop.f32.mrf.mxu0 }
 0x104   :  { %v959_v42 = vpop.f32.mrf.mxu1  ;;  %v938_v46 = vadd.f32 %v937_v41, %v936_v39 }
 0x105   :  { %v939_v43 = vpop.f32.mrf.mxu0  ;;  %v960_v49 = vadd.f32 %v959_v42, %v958_v40 }
 0x106   :  { %v961_v44 = vpop.f32.mrf.mxu1  ;;  %v702_v48 = vadd.f32 %v938_v46, %v855_v47 }
 0x107   :  { %v940_v37 = vpop.f32.mrf.mxu0 }
 0x108   :  { %v962_v45 = vpop.f32.mrf.mxu1  ;;  %v742_v53 = vadd.f32 %v960_v49, %v702_v48 }
 0x121   :  { %v980_v50 = vpop.f32.mrf.mxu0 }
 0x122   :  { %v1002_v51 = vpop.f32.mrf.mxu1 }
 0x123   :  { %v981_v52 = vpop.f32.mrf.mxu0 }
 0x124   :  { %v982_v54 = vadd.f32 %v981_v52, %v980_v50  ;;  %v1003_v55 = vpop.f32.mrf.mxu1 }
 0x125   :  { %v983_v56 = vpop.f32.mrf.mxu0  ;;  %v1004_v58 = vadd.f32 %v1003_v55, %v1002_v51 }
 0x126   :  { %v782_v57 = vadd.f32 %v982_v54, %v742_v53  ;;  %v1005_v59 = vpop.f32.mrf.mxu1 }
 0x127   :  { %v984_v60 = vpop.f32.mrf.mxu0 }
 0x128   :  { %v1006_v61 = vpop.f32.mrf.mxu1  ;;  %v822_v62 = vadd.f32 %v1004_v58, %v782_v57 }
 0x12a   :  { %827 = vmax.xlane.f32.xlu0 %v822_v62 }
 0x1b3   :  { %v828_v63 = vpop.xlane.xlu0 %827 }
 0x1b4   :  { %v829_v0 = vsub.f32 %v822_v62, %v828_v63 }
 0x1b6   :  { %v830_v1 = vmul.f32 1.442695, %v829_v0 }
 0x1b8   :  { %1094 = vpow2.f32 %v830_v1 }
 0x1c5   :  { %v1095_v2 = vpop.eup %1094 }
 0x1c6   :  { %832 = vadd.xlane.f32.xlu0 %v1095_v2 }
 0x24f   :  { %v833_v3 = vpop.xlane.xlu0 %832 }
 0x250   :  { %1096 = vrcp.f32 %v833_v3 }
 0x25d   :  { %v1097_v4 = vpop.eup %1096 }
 0x25e   :  { %v835_v5 = vmul.f32 %v1097_v4, %v1095_v2 }
 0x260   :  { %836 = vst [vmem:[#allocation7] sm:$0xff] %v835_v5 }
 0x261   :  { %841 = vsyncadd [#allocation4], 96  ;;  %s1171_s2 = smov [#allocation7]  }
 0x262   :  { %s842_s27 = sshll.u32 %s1171_s2, 4  ;;  %s843_s27 = int_to_ptr.vmem [resolvable:$true] %s842_s27 }
 0x263   :  { %s1138_s28 = scalar_lea.vmem %s843_s27, 32  ;;  %s1142_s29 = scalar_lea.vmem %s843_s27, 128 }
 0x264   :  { %p1139_p10 = scmp.ne.s32.totalorder %s843_s27, %s1138_s28  ;;  %p1143_p11 = scmp.lt.s32.totalorder %s843_s27, %s843_s27 }
 0x265   :  { %p1144_p12 = scmp.lt.s32.totalorder %s1142_s29, %s1138_s28 }
 0x267   :  { %p1145_p13 = por %p1144_p12, %p1143_p11 }
 0x269   :  { %p1146_p0 = pnand %p1145_p13, %p1139_p10 }
 0x26b   :  { %1149 = shalt.err (!%p1146_p0)
}
 0x26c   :  { %s1172_s30 = smov 32   ;;  %s1173_s4 = smov 2  }
 0x26d   :  { %848 = dma.vmem_to_hbm [thread:$0]  %s843_s27, 32, %s1219_s3, [#allocation4], %s1172_s30, %s1172_s30, %s1173_s4  }
 0x26e   :  { %1162 = dma.done.wait [#allocation4], 128  }
 0x26f   :  { %1163 = vsyncadd [#allocation4], 4294967168 }
 0x270   :  { %852 = vsyncpa [#allocation3], 1 }
 0x271   :  { %853 = vsyncpa [#allocation6], 1 }
 0x272   :  { %854 = vsyncpa [#allocation4], 1 }

</bundles_post_ra>
